<compile_context>
chip_gen: v7x
topology: tpu7x:2x2x1
jax: 0.10.0
libtpu: 0.0.40
codegen_flags: <defaults>
</compile_context>

<pallas_src>
import jax
import jax.numpy as jnp
from jax.experimental import pallas as pl
from jax.experimental.pallas import tpu as pltpu

_HIDDEN_OUT = 64  # lin1 out_features


def _round_up(x, m):
    return (x + m - 1) // m * m


def _fc_kernel(x_ref, w1_ref, b1_ref, w2_ref, b2_ref, o_ref):
    # x:  (TB, H)   w1: (H, 64)   b1: (1, 64)   w2: (1, 64)   b2: (1, 1)
    # o:  (TB, 1)
    h = jnp.dot(x_ref[...], w1_ref[...], preferred_element_type=jnp.float32)
    h = jnp.maximum(h + b1_ref[...], 0.0)                      # ReLU
    # dropout(p=0.5, training=False) -> identity (eval semantics).
    # Second linear has out_features=1: VPU multiply + cross-lane sum (XLU)
    # instead of a (64, 1) MXU matmul (single MXU output column + MRF pop).
    y = jnp.sum(h * w2_ref[...], axis=-1, keepdims=True) + b2_ref[...]
    o_ref[...] = y.astype(o_ref.dtype)


def _pick_batch_tile(B, H, itemsize):
    """Largest batch tile whose pipeline buffers fit a conservative VMEM budget.

    Budget ~20 MiB covers: 2x double-buffered (TB, H) x tiles, 2x (TB, 1)
    output tiles, the (TB, 64) intermediate, and the resident (H, 64) weight.
    Conservative for v7x (64 MiB physical / ~32 MiB scoped) and v5e defaults.
    """
    budget = 20 * 1024 * 1024
    tb = 1024
    while tb > 128 and (2 * tb * (H + 1) + tb * _HIDDEN_OUT
                        + H * _HIDDEN_OUT) * itemsize > budget:
        tb //= 2
    # Never tile wider than the (sublane-rounded) batch itself.
    return max(8, min(tb, _round_up(B, 8)))


def fully_connected_layer(x, w1, b1, w2, b2, *, batch_tile=None):
    """x: (B, H) f32.  w1: (H, 64), b1: (64,), w2: (64, 1), b2: (1,).

    Weights are stored pre-transposed as (in_features, out_features) relative
    to torch.nn.Linear, so the kernel computes plain x @ W + b.
    """
    B, H = x.shape
    itemsize = jnp.dtype(x.dtype).itemsize

    tb = batch_tile if batch_tile is not None else _pick_batch_tile(B, H, itemsize)
    tb = max(8, _round_up(int(tb), 8))
    B_pad = _round_up(B, tb)
    x_in = jnp.pad(x, ((0, B_pad - B), (0, 0))) if B_pad != B else x
    num_tiles = B_pad // tb

    b1_2d = b1.reshape(1, _HIDDEN_OUT)
    w2_row = w2.reshape(1, _HIDDEN_OUT)   # (64, 1) -> (1, 64) row for VPU path
    b2_2d = b2.reshape(1, 1)

    cost = pl.CostEstimate(
        flops=2 * B * H * _HIDDEN_OUT + 3 * B * _HIDDEN_OUT,
        transcendentals=0,
        bytes_accessed=(B * H + H * _HIDDEN_OUT + 2 * _HIDDEN_OUT + 1 + B) * itemsize,
    )

    out = pl.pallas_call(
        _fc_kernel,
        out_shape=jax.ShapeDtypeStruct((B_pad, 1), x.dtype),
        grid_spec=pltpu.PrefetchScalarGridSpec(
            num_scalar_prefetch=0,
            grid=(num_tiles,),
            in_specs=[
                pl.BlockSpec((tb, H), lambda i: (i, 0)),            # streamed x
                pl.BlockSpec((H, _HIDDEN_OUT), lambda i: (0, 0)),   # resident w1
                pl.BlockSpec((1, _HIDDEN_OUT), lambda i: (0, 0)),   # resident b1
                pl.BlockSpec((1, _HIDDEN_OUT), lambda i: (0, 0)),   # resident w2 row
                pl.BlockSpec((1, 1), lambda i: (0, 0)),             # resident b2
            ],
            out_specs=pl.BlockSpec((tb, 1), lambda i: (i, 0)),
        ),
        compiler_params=pltpu.CompilerParams(
            dimension_semantics=("parallel",),      # megacore shard on v7x
            vmem_limit_bytes=32 * 1024 * 1024,
        ),
        cost_estimate=cost,
    )(x_in, w1, b1_2d, w2_row, b2_2d)

    return out[:B] if B_pad != B else out


def init_params(key, hidden_channels):
    """Deterministic init mirroring nn.Linear's uniform(-1/sqrt(fan_in), +)."""
    k1, k2, k3, k4 = jax.random.split(key, 4)
    bound1 = 1.0 / jnp.sqrt(hidden_channels)
    bound2 = 1.0 / jnp.sqrt(64.0)
    # Stored already transposed: (in_features, out_features).
    w1 = jax.random.uniform(k1, (hidden_channels, 64), jnp.float32, -bound1, bound1)
    b1 = jax.random.uniform(k2, (64,), jnp.float32, -bound1, bound1)
    w2 = jax.random.uniform(k3, (64, 1), jnp.float32, -bound2, bound2)
    b2 = jax.random.uniform(k4, (1,), jnp.float32, -bound2, bound2)
    return w1, b1, w2, b2


if __name__ == "__main__":
    hidden_channels = 32
    batch = 8

    key = jax.random.PRNGKey(0)
    kx, kp, kx2 = jax.random.split(key, 3)
    x = jax.random.normal(kx, (batch, hidden_channels), dtype=jnp.float32)
    w1, b1, w2, b2 = init_params(kp, hidden_channels)

    # Small single-tile case.
    out = jax.block_until_ready(fully_connected_layer(x, w1, b1, w2, b2))
    ref = jnp.maximum(x @ w1 + b1, 0.0) @ w2 + b2
    assert out.shape == (batch, 1)
    assert jnp.allclose(out, ref, atol=1e-5, rtol=1e-5)

    # Exercise the multi-tile grid + batch-padding path with a forced tile.
    batch2 = 60
    x2 = jax.random.normal(kx2, (batch2, hidden_channels), dtype=jnp.float32)
    out2 = jax.block_until_ready(
        fully_connected_layer(x2, w1, b1, w2, b2, batch_tile=16))
    ref2 = jnp.maximum(x2 @ w1 + b1, 0.0) @ w2 + b2
    assert out2.shape == (batch2, 1)
    assert jnp.allclose(out2, ref2, atol=1e-5, rtol=1e-5)

    print("KERNEL_OK")
</pallas_src>

<mosaic_0001>
module attributes {stable_mosaic.version = 11 : i64} {
  func.func @_fc_kernel(%arg0: i32, %arg1: memref<8x32xf32, #tpu.memory_space<vmem>>, %arg2: memref<32x64xf32, #tpu.memory_space<vmem>>, %arg3: memref<1x64xf32, #tpu.memory_space<vmem>>, %arg4: memref<1x64xf32, #tpu.memory_space<vmem>>, %arg5: memref<1x1xf32, #tpu.memory_space<vmem>>, %arg6: memref<8x1xf32, #tpu.memory_space<vmem>>) attributes {dimension_semantics = [#tpu.dimension_semantics<parallel>], iteration_bounds = array<i64: 1>, scalar_prefetch = 0 : i64, scratch_operands = 0 : i64, tpu.core_type = #tpu.core_type<tc>, window_params = [{transform_indices = @transform_0, window_bounds = array<i64: 8, 32>}, {pipeline_mode = #tpu.pipeline_mode<synchronous>, transform_indices = @transform_1, window_bounds = array<i64: 32, 64>}, {pipeline_mode = #tpu.pipeline_mode<synchronous>, transform_indices = @transform_2, window_bounds = array<i64: 1, 64>}, {pipeline_mode = #tpu.pipeline_mode<synchronous>, transform_indices = @transform_3, window_bounds = array<i64: 1, 64>}, {pipeline_mode = #tpu.pipeline_mode<synchronous>, transform_indices = @transform_4, window_bounds = array<i64: 1, 1>}, {transform_indices = @transform_5, window_bounds = array<i64: 8, 1>}]} {
    %c0 = arith.constant 0 : index
    %c0_0 = arith.constant 0 : index
    %0 = vector.load %arg1[%c0, %c0_0] : memref<8x32xf32, #tpu.memory_space<vmem>>, vector<8x32xf32>
    %c0_1 = arith.constant 0 : index
    %c0_2 = arith.constant 0 : index
    %1 = vector.load %arg2[%c0_1, %c0_2] : memref<32x64xf32, #tpu.memory_space<vmem>>, vector<32x64xf32>
    %cst = arith.constant dense<0.000000e+00> : vector<8x64xf32>
    %2 = tpu.matmul %0, %1, %cst {dimension_numbers = #tpu.dot_dimension_numbers<[1], [0], [0], [1], [0, 0, 1, 1], [], []>} : vector<8x32xf32>, vector<32x64xf32>, vector<8x64xf32> -> vector<8x64xf32>
    %c0_3 = arith.constant 0 : index
    %c0_4 = arith.constant 0 : index
    %3 = vector.load %arg3[%c0_3, %c0_4] : memref<1x64xf32, #tpu.memory_space<vmem>>, vector<1x64xf32>
    %4 = vector.broadcast %3 : vector<1x64xf32> to vector<8x64xf32>
    %5 = arith.addf %2, %4 : vector<8x64xf32>
    %cst_5 = arith.constant 0.000000e+00 : f32
    %6 = vector.broadcast %cst_5 : f32 to vector<8x64xf32>
    %7 = arith.maximumf %5, %6 : vector<8x64xf32>
    %c0_6 = arith.constant 0 : index
    %c0_7 = arith.constant 0 : index
    %8 = vector.load %arg4[%c0_6, %c0_7] : memref<1x64xf32, #tpu.memory_space<vmem>>, vector<1x64xf32>
    %9 = vector.broadcast %8 : vector<1x64xf32> to vector<8x64xf32>
    %10 = arith.mulf %7, %9 : vector<8x64xf32>
    %cst_8 = arith.constant dense<0.000000e+00> : vector<8xf32>
    %11 = vector.multi_reduction <add>, %10, %cst_8 [1] : vector<8x64xf32> to vector<8xf32>
    %12 = vector.shape_cast %11 : vector<8xf32> to vector<8x1xf32>
    %c0_9 = arith.constant 0 : index
    %c0_10 = arith.constant 0 : index
    %13 = vector.load %arg5[%c0_9, %c0_10] : memref<1x1xf32, #tpu.memory_space<vmem>>, vector<1x1xf32>
    %14 = vector.broadcast %13 : vector<1x1xf32> to vector<8x1xf32>
    %15 = arith.addf %12, %14 : vector<8x1xf32>
    %c0_11 = arith.constant 0 : index
    %c0_12 = arith.constant 0 : index
    %16 = vector.load %arg6[%c0_11, %c0_12] : memref<8x1xf32, #tpu.memory_space<vmem>>, vector<8x1xf32>
    tpu.vector_store %arg6[%c0_11, %c0_12], %15 {strides = array<i32>} : memref<8x1xf32, #tpu.memory_space<vmem>>, vector<8x1xf32>,
    return
  }
  func.func @transform_0(%arg0: i32) -> (i32, i32) {
    %c0_i32 = arith.constant 0 : i32
    %c0_i32_0 = arith.constant 0 : i32
    return %arg0, %c0_i32 : i32, i32
  }
  func.func @transform_1(%arg0: i32) -> (i32, i32) {
    %c0_i32 = arith.constant 0 : i32
    %c0_i32_0 = arith.constant 0 : i32
    %c0_i32_1 = arith.constant 0 : i32
    return %c0_i32, %c0_i32_0 : i32, i32
  }
  func.func @transform_2(%arg0: i32) -> (i32, i32) {
    %c0_i32 = arith.constant 0 : i32
    %c0_i32_0 = arith.constant 0 : i32
    %c0_i32_1 = arith.constant 0 : i32
    return %c0_i32, %c0_i32_0 : i32, i32
  }
  func.func @transform_3(%arg0: i32) -> (i32, i32) {
    %c0_i32 = arith.constant 0 : i32
    %c0_i32_0 = arith.constant 0 : i32
    %c0_i32_1 = arith.constant 0 : i32
    return %c0_i32, %c0_i32_0 : i32, i32
  }
  func.func @transform_4(%arg0: i32) -> (i32, i32) {
    %c0_i32 = arith.constant 0 : i32
    %c0_i32_0 = arith.constant 0 : i32
    %c0_i32_1 = arith.constant 0 : i32
    return %c0_i32, %c0_i32_0 : i32, i32
  }
  func.func @transform_5(%arg0: i32) -> (i32, i32) {
    %c0_i32 = arith.constant 0 : i32
    %c0_i32_0 = arith.constant 0 : i32
    return %arg0, %c0_i32 : i32, i32
  }
}

</mosaic_0001>

<bundles_post_ra>
// kernel: tpu_custom_call.1
= control target key start
LH: loop header
LB: loop body
LE: loop exit
PB: predicated region body
PF: predicated region fallthrough
CT: control target
= control target key end

     0   :  { %s324_s0 = inlined_call_operand.hbm [shape: f32[8,32], index: 0, kind: input, shape index: {}]   ;;  %s325_s1 = inlined_call_operand.hbm [shape: f32[32,64], index: 1, kind: input, shape index: {}]   ;;  %s326_s2 = inlined_call_operand.vmem [shape: f32[1,64], index: 2, kind: input, shape index: {}]   ;;  %s327_s3 = inlined_call_operand.vmem [shape: f32[1,64], index: 3, kind: input, shape index: {}]   ;;  %s328_s4 = inlined_call_operand.<no memory space> [shape: f32[1,1], index: 4, kind: input, shape index: {}]   ;;  %s329_s5 = inlined_call_operand.vmem [shape: f32[8,1], index: 5, kind: output, shape index: {}]  }
   0x1   :  { %v10_v0 = vstv %s328_s4 }
   0x2   :  { %11 = vst [vmem:[#allocation2] sm:$0x1] %v10_v0 }
   0x3   :  { %12 = vsyncpa [#allocation4], 0 }
   0x4   :  { %13 = vsyncpa [#allocation6], 0  ;;  %s244_s20 = smov [#allocation3]   ;;  %s245_s22 = smov [#allocation5]  }
   0x5   :  { %s20_s21 = sshll.u32 %s244_s20, 4  ;;  %s29_s23 = sshll.u32 %s245_s22, 4  ;;  %s21_s21 = int_to_ptr.vmem [resolvable:$true] %s20_s21  ;;  %s284_s23 = int_to_ptr.vmem [resolvable:$true] %s29_s23 }
   0x6   :  { %s196_s26 = scalar_lea.hbm %s324_s0, 128 }
   0x7   :  { %p197_p0 = scmp.ne.s32.totalorder %s324_s0, %s196_s26  ;;  %p200_p1 = scmp.lt.u32.totalorder %s196_s26, %s324_s0 }
   0x9   :  { %p202_p2 = pnand %p200_p1, %p197_p0 }
   0xb   :  { %205 = shalt.err (!%p202_p2)
}
   0xc   :  { %s206_s30 = scalar_lea.vmem %s21_s21, 128  ;;  %p211_p4 = scmp.lt.s32.totalorder %s21_s21, %s21_s21 }
   0xd   :  { %p207_p3 = scmp.ne.s32.totalorder %s21_s21, %s206_s30  ;;  %p212_p5 = scmp.lt.s32.totalorder %s206_s30, %s206_s30 }
   0xf   :  { %p213_p6 = por %p212_p5, %p211_p4 }
  0x11   :  { %p214_p7 = pnand %p213_p6, %p207_p3 }
  0x13   :  { %217 = shalt.err (!%p214_p7)
}
  0x14   :  { %23 = dma.hbm_to_vmem [thread:$0]  %s324_s0, 128, %s21_s21, [#allocation4]  }
  0x15   :  { %s218_s10 = scalar_lea.hbm %s325_s1, 512 }
  0x16   :  { %p219_p8 = scmp.ne.s32.totalorder %s325_s1, %s218_s10  ;;  %p222_p9 = scmp.lt.u32.totalorder %s218_s10, %s325_s1 }
  0x18   :  { %p224_p10 = pnand %p222_p9, %p219_p8 }
  0x1a   :  { %227 = shalt.err (!%p224_p10)
}
  0x1b   :  { %s228_s15 = scalar_lea.vmem %s284_s23, 512  ;;  %p233_p12 = scmp.lt.s32.totalorder %s284_s23, %s284_s23 }
  0x1c   :  { %p229_p11 = scmp.ne.s32.totalorder %s284_s23, %s228_s15  ;;  %p234_p13 = scmp.lt.s32.totalorder %s228_s15, %s228_s15 }
  0x1e   :  { %p235_p0 = por %p234_p13, %p233_p12 }
  0x20   :  { %p236_p1 = pnand %p235_p0, %p229_p11 }
  0x22   :  { %239 = shalt.err (!%p236_p1)
}
  0x23   :  { %s246_s0 = smov 128   ;;  %s247_s16 = smov 8  }
  0x24   :  { %35 = dma.hbm_to_vmem [thread:$0]  %s325_s1, 512, %s284_s23, [#allocation6], %s246_s0, %s246_s0, %s247_s16  }
  0x25   :  { %240 = dma.done.wait [#allocation4], 128  }
  0x26   :  { %241 = vsyncadd [#allocation4], 4294967168 }
  0x27   :  { %242 = dma.done.wait [#allocation6], 512  }
  0x28   :  { %243 = vsyncadd [#allocation6], 4294966784  ;;  %v248_v1 = vmov 0.0|0.0   ;;  %vm249_vm0 = vmmov 0   ;;  %v250_v2 = vmov 0.0   ;;  %v49_v3 = vld [vmem:[#allocation5] sm:$0xff] }
  0x29   :  { %183 = vmatprep.subr.bf16.mxu0 %v248_v1  ;;  %180 = vmatprep.mubr.msk.f32.mxu0 %vm249_vm0, %v250_v2  ;;  %v50_v4 = vld [vmem:[#allocation5 + $0x8] sm:$0xff]  ;;  %v51_v5 = vld [vmem:[#allocation5 + $0x10] sm:$0xff]  ;;  %v52_v7 = vld [vmem:[#allocation5 + $0x18] sm:$0xff]  ;;  %vm60_vm1 = vcmask 261120   ;;  %vm143_vm2 = vcmask 523264   ;;  %vm155_vm3 = vcmask 7168  }
  0x2a   :  { %v184_v6 = vpack.c.bf16 %v50_v4, %v49_v3  ;;  %v187_v8 = vpack.c.bf16 %v52_v7, %v51_v5  ;;  %v48_v9 = vld [vmem:[#allocation3] sm:$0xff]  ;;  %v163_v10 = vld [vmem:[%s326_s2] ss:$0 sm:$0xff] }
  0x2b   :  { %v165_v14 = vld [vmem:[%s327_s3] ss:$0 sm:$0xff] }
  0x2c   :  { %185 = vmatpush3.bf16.msra.mxu0 %v184_v6  ;;  %v166_v18 = vld [vmem:[#allocation2] ss:$0 sm:$0xff] }
  0x2d   :  { %186 = vmatprep.subr.bf16.mxu0 %v248_v1 }
  0x30   :  { %188 = vmatpush3.bf16.msra.mxu0 %v187_v8 }
  0x33   :  { %181 = vmatmul.mubr.msk.f32.vlgmr.msra.gmra.mrb[0].mxu0 %vm60_vm1, %v48_v9 }
 0x106   :  { %v130_v11 = vpop.f32.mrb[0].mxu0 }
 0x107   :  { %v131_v12 = vadd.f32 %v163_v10, %v130_v11  ;;  %v182_v13 = vpop.f32.mrb[1].mxu0 }
 0x109   :  { %v134_v15 = vmax.f32 %v131_v12, 0.0 }
 0x10b   :  { %v142_v16 = vmul.f32 %v165_v14, %v134_v15 }
 0x10d   :  { %v144_v17 = vsel %vm143_vm2, %v142_v16, 0.0 }
 0x10e   :  { %145 = vadd.xlane.f32.xlu0 %v144_v17 }
 0x19b   :  { %v146_v19 = vpop.xlane.xlu0 %145 }
 0x19c   :  { %v154_v20 = vadd.f32 %v166_v18, %v146_v19 }
 0x19e   :  { %156 = vst.msk [vmem:[%s329_s5] sm:$0xff] %vm155_vm3, %v154_v20 }
 0x19f   :  { %161 = vsyncpa [#allocation4], 1 }
 0x1a0   :  { %162 = vsyncpa [#allocation6], 1 }

</bundles_post_ra>
